<compile_context>
chip_gen: v6e
topology: v6e:2x2x1
jax: 0.10.0
libtpu: 0.0.40
codegen_flags: <defaults>
</compile_context>

<pallas_src>
import dataclasses
from functools import partial

import jax
import jax.numpy as jnp
import numpy as np
from jax.experimental import pallas as pl
from jax.experimental.pallas import tpu as pltpu


# ----------------------------------------------------------------------------
# Tiling / budget helpers
# ----------------------------------------------------------------------------
def _vmem_limit_bytes():
    """~75% of physical VMEM (v5e/v6e: 128 MiB, v7x: 64 MiB per TC)."""
    try:
        cap = pltpu.get_tpu_info().vmem_capacity_bytes
        return int(cap * 3 // 4)
    except Exception:
        return 48 * 1024 * 1024


_VMEM_LIMIT = _vmem_limit_bytes()


def _batch_tile(b, cap=8):
    """Largest batch tile <= cap that divides b and is sublane friendly."""
    for t in range(min(b, cap), 0, -1):
        if b % t == 0 and (t % 8 == 0 or t == b):
            return t
    return b


def _row_tile(n, cap=1024):
    """Row tile for flattened (rows, H) arrays: prefer 256-multiples (MXU)."""
    if n <= cap:
        return n
    for step in (256, 128, 8):
        t = (cap // step) * step
        while t >= step:
            if n % t == 0:
                return t
            t -= step
    return n


# ----------------------------------------------------------------------------
# Kernels
# ----------------------------------------------------------------------------
def _encoder_kernel(x_ref, m_ref, we_ref, be_ref, wu_ref, bu_ref,
                    w1_ref, b1_ref, w2_ref, b2_ref,
                    pos_ref, pred_ref, uemb_ref, logits_ref):
    """Fused: event proj -> user encoder -> masked pool -> classifier head."""
    BT, S, H = x_ref.shape
    M = BT * S

    # ---- EventEncoder stand-in: linear + tanh (bf16 MXU feed, f32 accumulate)
    # TODO(synk): real EventEncoder is an external LLM backbone.
    x = x_ref[...].reshape(M, H)                                   # bf16 (cast in glue)
    h1 = jnp.tanh(jnp.dot(x, we_ref[...], preferred_element_type=jnp.float32)
                  + be_ref[...])                                   # (M, H) f32
    pos_ref[...] = h1.reshape(BT, S, H).astype(pos_ref.dtype)

    # ---- UserEncoder stand-in: linear + tanh -> per-token predictions
    h2 = jnp.tanh(jnp.dot(h1.astype(jnp.bfloat16), wu_ref[...],
                          preferred_element_type=jnp.float32) + bu_ref[...])
    pred_ref[...] = h2.reshape(BT, S, H).astype(pred_ref.dtype)

    # ---- masked mean pool -> user embedding (vectorized VPU/XLU, no matvecs)
    m = m_ref[...]                                                 # (BT, S) f32
    h2_3d = h2.reshape(BT, S, H)
    pooled = jnp.sum(h2_3d * m[:, :, None], axis=1)                # (BT, H)
    denom = jnp.maximum(jnp.sum(m, axis=1, keepdims=True), 1.0)    # (BT, 1)
    uemb = pooled / denom
    uemb_ref[...] = uemb.astype(uemb_ref.dtype)

    # ---- ClassificationHead: Linear -> ReLU -> Linear (lane-padded output)
    c1 = jnp.dot(uemb.astype(jnp.bfloat16), w1_ref[...],
                 preferred_element_type=jnp.float32) + b1_ref[...]
    c1 = jnp.maximum(c1, 0.0)
    logits = jnp.dot(c1.astype(jnp.bfloat16), w2_ref[...],
                     preferred_element_type=jnp.float32) + b2_ref[...]
    logits_ref[...] = logits.astype(logits_ref.dtype)


def _neg_proj_kernel(x_ref, we_ref, be_ref, o_ref):
    """Event projection for negatives, flattened (rows, H) and row-tiled.

    L2 normalization is hoisted here (negatives are only ever consumed by the
    NCE loss AFTER normalization), so the NCE inner loop does no per-step work
    on negatives beyond the matmul.
    """
    x = x_ref[...]                                                 # bf16
    h = jnp.tanh(jnp.dot(x, we_ref[...], preferred_element_type=jnp.float32)
                 + be_ref[...])
    h = h * jax.lax.rsqrt(jnp.sum(h * h, axis=-1, keepdims=True) + 1e-12)
    o_ref[...] = h.astype(o_ref.dtype)                             # bf16, normalized


def _nce_kernel(nce_threshold, temp_ref, valid_ref, pred_ref, pos_ref, neg_ref,
                loss_ref, pp_sc, stats_sc):
    """GenerativeInfoNCE with negatives tiled along grid axis 1 (online LSE).

    pp_sc:    (2, M, H) bf16  -- [pred_norm * temperature ; pos_norm]
    stats_sc: (M, 128)  f32   -- col 0: running max, col 1: running sum-exp,
                                  col 2: positive logit (temp-scaled).
    """
    nj = pl.program_id(1)
    last_nj = pl.num_programs(1) - 1
    BT, S, H = pred_ref.shape
    M = BT * S
    eps = 1e-12

    @pl.when(nj == 0)
    def _init():
        temp = temp_ref[0]
        pred = pred_ref[...].astype(jnp.float32).reshape(M, H)
        pos = pos_ref[...].astype(jnp.float32).reshape(M, H)
        # Align predictions[:, :-1] with positives[:, 1:] (full-S, tile aligned);
        # the wrapped last row of every sequence is zeroed by the validity mask.
        # NOTE: keep this roll and the (arange < S-1) mask construction coupled.
        pos = jnp.roll(pos, shift=-1, axis=0)
        pred = pred * jax.lax.rsqrt(jnp.sum(pred * pred, axis=-1, keepdims=True) + eps)
        pos = pos * jax.lax.rsqrt(jnp.sum(pos * pos, axis=-1, keepdims=True) + eps)
        pred_scaled = pred * temp                       # fold temperature once
        sp = jnp.sum(pred_scaled * pos, axis=-1, keepdims=True)    # (M, 1) pos logit
        pp_sc[0] = pred_scaled.astype(pp_sc.dtype)
        pp_sc[1] = pos.astype(pp_sc.dtype)
        stats_sc[:, 0:1] = sp                           # running max (pos included)
        stats_sc[:, 1:2] = jnp.ones_like(sp)            # exp(sp - sp) = 1
        stats_sc[:, 2:3] = sp                           # positive logit for finalize

    # Negatives arrive pre-normalized bf16; ONE stacked [pred*temp ; pos] matmul
    # scores both halves against this negatives tile (row-major negatives).
    negs = neg_ref[...]                                             # (NT, H) bf16
    scores = jax.lax.dot_general(
        pp_sc[...].reshape(2 * M, H), negs,
        (((1,), (1,)), ((), ())), preferred_element_type=jnp.float32)  # (2M, NT)
    neg_scores = scores[:M, :]                          # already temperature scaled
    # TODO(synk): collision similarities come from a bf16 MXU matmul; values very
    #   close to nce_threshold may flip vs the f32 PyTorch reference.
    collide = scores[M:, :] > nce_threshold
    neg_scores = jnp.where(collide, -1e30, neg_scores)  # finite sentinel, post-temp

    # Online logsumexp update over this negatives tile.
    m_prev = stats_sc[:, 0:1]
    l_prev = stats_sc[:, 1:2]
    m_new = jnp.maximum(m_prev, jnp.max(neg_scores, axis=-1, keepdims=True))
    stats_sc[:, 1:2] = (jnp.exp(m_prev - m_new) * l_prev
                        + jnp.sum(jnp.exp(neg_scores - m_new), axis=-1, keepdims=True))
    stats_sc[:, 0:1] = m_new

    @pl.when(nj == last_nj)
    def _finalize():
        per_tok = stats_sc[:, 0:1] + jnp.log(stats_sc[:, 1:2]) - stats_sc[:, 2:3]
        loss_ref[...] = jnp.sum(per_tok * valid_ref[...], keepdims=True).reshape(1, 1, 1)


# ----------------------------------------------------------------------------
# Pallas wrappers
# ----------------------------------------------------------------------------
def fused_user_encoder(x_bf16, attention_mask, we, be, wu, bu, w1, b1, w2p, b2p):
    B, S, H = x_bf16.shape
    Cp = w2p.shape[1]
    bt = _batch_tile(B)
    nbt = B // bt
    mask = attention_mask.astype(jnp.float32)

    return pl.pallas_call(
        _encoder_kernel,
        out_shape=(
            jax.ShapeDtypeStruct((B, S, H), jnp.bfloat16),   # event embeddings
            jax.ShapeDtypeStruct((B, S, H), jnp.bfloat16),   # predictions
            jax.ShapeDtypeStruct((B, H), jnp.float32),       # user embedding
            jax.ShapeDtypeStruct((B, Cp), jnp.float32),      # padded logits
        ),
        grid=(nbt,),
        in_specs=[
            pl.BlockSpec((bt, S, H), lambda i: (i, 0, 0)),
            pl.BlockSpec((bt, S), lambda i: (i, 0)),
            pl.BlockSpec((H, H), lambda i: (0, 0)),
            pl.BlockSpec((1, H), lambda i: (0, 0)),
            pl.BlockSpec((H, H), lambda i: (0, 0)),
            pl.BlockSpec((1, H), lambda i: (0, 0)),
            pl.BlockSpec((H, H), lambda i: (0, 0)),
            pl.BlockSpec((1, H), lambda i: (0, 0)),
            pl.BlockSpec((H, Cp), lambda i: (0, 0)),
            pl.BlockSpec((1, Cp), lambda i: (0, 0)),
        ],
        out_specs=(
            pl.BlockSpec((bt, S, H), lambda i: (i, 0, 0)),
            pl.BlockSpec((bt, S, H), lambda i: (i, 0, 0)),
            pl.BlockSpec((bt, H), lambda i: (i, 0)),
            pl.BlockSpec((bt, Cp), lambda i: (i, 0)),
        ),
        compiler_params=pltpu.CompilerParams(
            dimension_semantics=("parallel",),
            vmem_limit_bytes=_VMEM_LIMIT),
    )(x_bf16, mask, we, be, wu, bu, w1, b1, w2p, b2p)


def negative_projection(x2d_bf16, we, be):
    """Project + L2-normalize flattened negatives (Nall, H) -> bf16."""
    M, H = x2d_bf16.shape
    mt = _row_tile(M, cap=1024)
    return pl.pallas_call(
        _neg_proj_kernel,
        out_shape=jax.ShapeDtypeStruct((M, H), jnp.bfloat16),
        grid=(M // mt,),
        in_specs=[
            pl.BlockSpec((mt, H), lambda i: (i, 0)),
            pl.BlockSpec((H, H), lambda i: (0, 0)),
            pl.BlockSpec((1, H), lambda i: (0, 0)),
        ],
        out_specs=pl.BlockSpec((mt, H), lambda i: (i, 0)),
        compiler_params=pltpu.CompilerParams(
            dimension_semantics=("parallel",),
            vmem_limit_bytes=_VMEM_LIMIT),
    )(x2d_bf16, we, be)


def generative_infonce_loss(predictions, positives, negatives_flat, attention_mask,
                            log_inv_temperature, nce_threshold):
    """Faithful to GenerativeInfoNCELoss.forward (3-D / padded path)."""
    B, S, H = predictions.shape
    Nall = negatives_flat.shape[0]
    bt = _batch_tile(B)
    nbt = B // bt
    nt = _row_tile(Nall, cap=1024)
    nnt = Nall // nt
    M = bt * S

    temp = jnp.exp(jnp.clip(log_inv_temperature, 0.0, np.log(50.0))).reshape(1)
    # == attention_mask[:, :-1] token selection of the original loss
    valid = (attention_mask.astype(jnp.float32)
             * (jnp.arange(S) < S - 1).astype(jnp.float32))        # (B, S)
    valid_col = valid.reshape(B * S, 1)

    loss_parts = pl.pallas_call(
        partial(_nce_kernel, nce_threshold),
        out_shape=jax.ShapeDtypeStruct((nbt, 1, 1), jnp.float32),
        grid=(nbt, nnt),
        in_specs=[
            pl.BlockSpec(memory_space=pltpu.MemorySpace.SMEM),     # temperature
            pl.BlockSpec((M, 1), lambda i, j: (i, 0)),             # validity mask
            pl.BlockSpec((bt, S, H), lambda i, j: (i, 0, 0)),      # predictions
            pl.BlockSpec((bt, S, H), lambda i, j: (i, 0, 0)),      # positives
            pl.BlockSpec((nt, H), lambda i, j: (j, 0)),            # negatives tile
        ],
        out_specs=pl.BlockSpec((1, 1, 1), lambda i, j: (i, 0, 0)),
        scratch_shapes=[
            pltpu.VMEM((2, M, H), jnp.bfloat16),   # [pred*temp ; pos], normalized
            pltpu.VMEM((M, 128), jnp.float32),     # packed online-LSE stats
        ],
        compiler_params=pltpu.CompilerParams(
            dimension_semantics=("parallel", "arbitrary"),
            vmem_limit_bytes=_VMEM_LIMIT),
    )(temp, valid_col, predictions, positives, negatives_flat)

    # F.cross_entropy(reduction='mean') over the mask-selected tokens
    denom = jnp.maximum(jnp.sum(valid), 1.0)
    return jnp.sum(loss_parts) / denom


# ----------------------------------------------------------------------------
# Model (parameters + forward)
# ----------------------------------------------------------------------------
@dataclasses.dataclass
class HierarchicalModelOutput:
    hidden_states: jnp.ndarray
    user_embedding: jnp.ndarray = None
    logits: jnp.ndarray = None
    nce_loss: jnp.ndarray = None
    ce_loss: jnp.ndarray = None
    loss: jnp.ndarray = None


class HierarchicalModelPallas:
    def __init__(self, vocab_size, max_pos, hidden, num_classes,
                 temperature=0.1, nce_threshold=0.99, seed=0):
        key = jax.random.PRNGKey(seed)
        ks = jax.random.split(key, 8)
        s = 0.02
        self.embed_tok = s * jax.random.normal(ks[0], (vocab_size, hidden), jnp.float32)
        self.embed_pos = s * jax.random.normal(ks[1], (max_pos, hidden), jnp.float32)
        self.event_w = s * jax.random.normal(ks[2], (hidden, hidden), jnp.float32)
        self.event_b = jnp.zeros((1, hidden), jnp.float32)
        self.user_w = s * jax.random.normal(ks[3], (hidden, hidden), jnp.float32)
        self.user_b = jnp.zeros((1, hidden), jnp.float32)
        self.cls_w1 = s * jax.random.normal(ks[4], (hidden, hidden), jnp.float32)
        self.cls_b1 = jnp.zeros((1, hidden), jnp.float32)
        # classifier output padded to a lane-dense multiple of 128
        cp = max(128, ((num_classes + 127) // 128) * 128)
        w2 = s * jax.random.normal(ks[5], (hidden, num_classes), jnp.float32)
        self.cls_w2p = jnp.zeros((hidden, cp), jnp.float32).at[:, :num_classes].set(w2)
        self.cls_b2p = jnp.zeros((1, cp), jnp.float32)
        # bf16 weight copies fed to the MXU (f32 masters kept above)
        self.event_w_lp = self.event_w.astype(jnp.bfloat16)
        self.user_w_lp = self.user_w.astype(jnp.bfloat16)
        self.cls_w1_lp = self.cls_w1.astype(jnp.bfloat16)
        self.cls_w2p_lp = self.cls_w2p.astype(jnp.bfloat16)
        # GenerativeInfoNCELoss parameter: log(1/temperature)
        self.log_inv_temp = jnp.asarray(np.log(1.0 / temperature), jnp.float32)
        self.nce_threshold = nce_threshold
        self.num_classes = num_classes
        self.hidden = hidden

    def _embed(self, input_ids, position_ids):
        # TODO(synk): real EventEncoder packs variable-length token sequences into
        # an LLM backbone; stand-in: embedding lookup (glue) + linear projection.
        emb = self.embed_tok[input_ids] + self.embed_pos[position_ids]
        return emb.astype(jnp.bfloat16)   # bf16 in HBM: half the DMA into kernels

    def forward(self, pos_input_ids, pos_position_ids, attention_mask,
                neg_input_ids=None, neg_position_ids=None, labels=None):
        H = self.hidden

        # Fused: event projection + user encoder + masked pool + classifier head.
        x = self._embed(pos_input_ids, pos_position_ids)          # (B, S, H) bf16
        pos_hidden, predictions, user_embedding, logits_pad = fused_user_encoder(
            x, attention_mask,
            self.event_w_lp, self.event_b,
            self.user_w_lp, self.user_b,
            self.cls_w1_lp, self.cls_b1,
            self.cls_w2p_lp, self.cls_b2p)
        logits = logits_pad[:, :self.num_classes]

        if labels is not None:
            lse = jax.nn.logsumexp(logits, axis=-1)
            picked = jnp.take_along_axis(logits, labels[:, None], axis=-1)[:, 0]
            ce_loss = jnp.mean(lse - picked)
        else:
            ce_loss = jnp.asarray(0.0, jnp.float32)

        if neg_input_ids is not None:
            xneg = self._embed(neg_input_ids, neg_position_ids)   # (B, NN, H) bf16
            # Projected AND normalized negatives (only consumed by the NCE loss).
            neg_hidden_flat = negative_projection(
                xneg.reshape(-1, H), self.event_w_lp, self.event_b)  # (Nall, H) bf16
            nce_loss = generative_infonce_loss(
                predictions=predictions,
                positives=pos_hidden,
                negatives_flat=neg_hidden_flat,
                attention_mask=attention_mask,
                log_inv_temperature=self.log_inv_temp,
                nce_threshold=self.nce_threshold)
        else:
            nce_loss = jnp.asarray(0.0, jnp.float32)

        return HierarchicalModelOutput(
            hidden_states=predictions,
            user_embedding=user_embedding,
            logits=logits,
            nce_loss=nce_loss,
            ce_loss=ce_loss)


# ----------------------------------------------------------------------------
# Demo
# ----------------------------------------------------------------------------
if __name__ == "__main__":
    B, S, H = 2, 8, 32
    NUM_NEG = 8
    VOCAB, MAX_POS, NUM_CLASSES = 64, 16, 4

    key = jax.random.PRNGKey(0)
    k1, k2, k3 = jax.random.split(key, 3)

    pos_input_ids = jax.random.randint(k1, (B, S), 0, VOCAB)
    pos_position_ids = jnp.tile(jnp.arange(S), (B, 1))
    attention_mask = jnp.array(
        [[1, 1, 1, 1, 1, 1, 0, 0],
         [1, 1, 1, 1, 1, 1, 1, 1]], jnp.int32)
    neg_input_ids = jax.random.randint(k2, (B, NUM_NEG), 0, VOCAB)
    neg_position_ids = jnp.tile(jnp.arange(NUM_NEG), (B, 1))
    labels = jax.random.randint(k3, (B,), 0, NUM_CLASSES)

    model = HierarchicalModelPallas(
        vocab_size=VOCAB, max_pos=MAX_POS, hidden=H, num_classes=NUM_CLASSES,
        temperature=0.1, nce_threshold=0.99, seed=0)

    out = model.forward(pos_input_ids, pos_position_ids, attention_mask,
                        neg_input_ids=neg_input_ids,
                        neg_position_ids=neg_position_ids,
                        labels=labels)

    jax.block_until_ready(out.hidden_states)
    jax.block_until_ready(out.user_embedding)
    jax.block_until_ready(out.logits)
    jax.block_until_ready(out.nce_loss)
    jax.block_until_ready(out.ce_loss)

    assert out.hidden_states.shape == (B, S, H)
    assert out.user_embedding.shape == (B, H)
    assert out.logits.shape == (B, NUM_CLASSES)
    assert bool(jnp.isfinite(out.nce_loss)) and bool(jnp.isfinite(out.ce_loss))

    print("KERNEL_OK")
</pallas_src>

<mosaic_0001>
module attributes {stable_mosaic.version = 11 : i64} {
  func.func @_encoder_kernel(%arg0: i32, %arg1: memref<2x8x32xbf16, #tpu.memory_space<vmem>>, %arg2: memref<2x8xf32, #tpu.memory_space<vmem>>, %arg3: memref<32x32xbf16, #tpu.memory_space<vmem>>, %arg4: memref<1x32xf32, #tpu.memory_space<vmem>>, %arg5: memref<32x32xbf16, #tpu.memory_space<vmem>>, %arg6: memref<1x32xf32, #tpu.memory_space<vmem>>, %arg7: memref<32x32xbf16, #tpu.memory_space<vmem>>, %arg8: memref<1x32xf32, #tpu.memory_space<vmem>>, %arg9: memref<32x128xbf16, #tpu.memory_space<vmem>>, %arg10: memref<1x128xf32, #tpu.memory_space<vmem>>, %arg11: memref<2x8x32xbf16, #tpu.memory_space<vmem>>, %arg12: memref<2x8x32xbf16, #tpu.memory_space<vmem>>, %arg13: memref<2x32xf32, #tpu.memory_space<vmem>>, %arg14: memref<2x128xf32, #tpu.memory_space<vmem>>) attributes {dimension_semantics = [#tpu.dimension_semantics<parallel>], iteration_bounds = array<i64: 1>, scalar_prefetch = 0 : i64, scratch_operands = 0 : i64, tpu.core_type = #tpu.core_type<tc>, window_params = [{transform_indices = @transform_0, window_bounds = array<i64: 2, 8, 32>}, {transform_indices = @transform_1, window_bounds = array<i64: 2, 8>}, {pipeline_mode = #tpu.pipeline_mode<synchronous>, transform_indices = @transform_2, window_bounds = array<i64: 32, 32>}, {pipeline_mode = #tpu.pipeline_mode<synchronous>, transform_indices = @transform_3, window_bounds = array<i64: 1, 32>}, {pipeline_mode = #tpu.pipeline_mode<synchronous>, transform_indices = @transform_4, window_bounds = array<i64: 32, 32>}, {pipeline_mode = #tpu.pipeline_mode<synchronous>, transform_indices = @transform_5, window_bounds = array<i64: 1, 32>}, {pipeline_mode = #tpu.pipeline_mode<synchronous>, transform_indices = @transform_6, window_bounds = array<i64: 32, 32>}, {pipeline_mode = #tpu.pipeline_mode<synchronous>, transform_indices = @transform_7, window_bounds = array<i64: 1, 32>}, {pipeline_mode = #tpu.pipeline_mode<synchronous>, transform_indices = @transform_8, window_bounds = array<i64: 32, 128>}, {pipeline_mode = #tpu.pipeline_mode<synchronous>, transform_indices = @transform_9, window_bounds = array<i64: 1, 128>}, {transform_indices = @transform_10, window_bounds = array<i64: 2, 8, 32>}, {transform_indices = @transform_11, window_bounds = array<i64: 2, 8, 32>}, {transform_indices = @transform_12, window_bounds = array<i64: 2, 32>}, {transform_indices = @transform_13, window_bounds = array<i64: 2, 128>}]} {
    %c0 = arith.constant 0 : index
    %c0_0 = arith.constant 0 : index
    %c0_1 = arith.constant 0 : index
    %0 = vector.load %arg1[%c0, %c0_0, %c0_1] : memref<2x8x32xbf16, #tpu.memory_space<vmem>>, vector<2x8x32xbf16>
    %1 = vector.shape_cast %0 : vector<2x8x32xbf16> to vector<16x32xbf16>
    %c0_2 = arith.constant 0 : index
    %c0_3 = arith.constant 0 : index
    %2 = vector.load %arg3[%c0_2, %c0_3] : memref<32x32xbf16, #tpu.memory_space<vmem>>, vector<32x32xbf16>
    %cst = arith.constant dense<0.000000e+00> : vector<16x32xf32>
    %3 = tpu.matmul %1, %2, %cst {dimension_numbers = #tpu.dot_dimension_numbers<[1], [0], [0], [1], [0, 0, 1, 1], [], []>} : vector<16x32xbf16>, vector<32x32xbf16>, vector<16x32xf32> -> vector<16x32xf32>
    %c0_4 = arith.constant 0 : index
    %c0_5 = arith.constant 0 : index
    %4 = vector.load %arg4[%c0_4, %c0_5] : memref<1x32xf32, #tpu.memory_space<vmem>>, vector<1x32xf32>
    %5 = vector.broadcast %4 : vector<1x32xf32> to vector<16x32xf32>
    %6 = arith.addf %3, %5 : vector<16x32xf32>
    %7 = math.tanh %6 : vector<16x32xf32>
    %8 = vector.shape_cast %7 : vector<16x32xf32> to vector<2x8x32xf32>
    %9 = arith.truncf %8 : vector<2x8x32xf32> to vector<2x8x32xbf16>
    %c0_6 = arith.constant 0 : index
    %c0_7 = arith.constant 0 : index
    %c0_8 = arith.constant 0 : index
    %10 = vector.load %arg11[%c0_6, %c0_7, %c0_8] : memref<2x8x32xbf16, #tpu.memory_space<vmem>>, vector<2x8x32xbf16>
    tpu.vector_store %arg11[%c0_6, %c0_7, %c0_8], %9 {strides = array<i32>} : memref<2x8x32xbf16, #tpu.memory_space<vmem>>, vector<2x8x32xbf16>,
    %11 = arith.truncf %7 : vector<16x32xf32> to vector<16x32xbf16>
    %c0_9 = arith.constant 0 : index
    %c0_10 = arith.constant 0 : index
    %12 = vector.load %arg5[%c0_9, %c0_10] : memref<32x32xbf16, #tpu.memory_space<vmem>>, vector<32x32xbf16>
    %cst_11 = arith.constant dense<0.000000e+00> : vector<16x32xf32>
    %13 = tpu.matmul %11, %12, %cst_11 {dimension_numbers = #tpu.dot_dimension_numbers<[1], [0], [0], [1], [0, 0, 1, 1], [], []>} : vector<16x32xbf16>, vector<32x32xbf16>, vector<16x32xf32> -> vector<16x32xf32>
    %c0_12 = arith.constant 0 : index
    %c0_13 = arith.constant 0 : index
    %14 = vector.load %arg6[%c0_12, %c0_13] : memref<1x32xf32, #tpu.memory_space<vmem>>, vector<1x32xf32>
    %15 = vector.broadcast %14 : vector<1x32xf32> to vector<16x32xf32>
    %16 = arith.addf %13, %15 : vector<16x32xf32>
    %17 = math.tanh %16 : vector<16x32xf32>
    %18 = vector.shape_cast %17 : vector<16x32xf32> to vector<2x8x32xf32>
    %19 = arith.truncf %18 : vector<2x8x32xf32> to vector<2x8x32xbf16>
    %c0_14 = arith.constant 0 : index
    %c0_15 = arith.constant 0 : index
    %c0_16 = arith.constant 0 : index
    %20 = vector.load %arg12[%c0_14, %c0_15, %c0_16] : memref<2x8x32xbf16, #tpu.memory_space<vmem>>, vector<2x8x32xbf16>
    tpu.vector_store %arg12[%c0_14, %c0_15, %c0_16], %19 {strides = array<i32>} : memref<2x8x32xbf16, #tpu.memory_space<vmem>>, vector<2x8x32xbf16>,
    %c0_17 = arith.constant 0 : index
    %c0_18 = arith.constant 0 : index
    %21 = vector.load %arg2[%c0_17, %c0_18] : memref<2x8xf32, #tpu.memory_space<vmem>>, vector<2x8xf32>
    %22 = vector.shape_cast %17 : vector<16x32xf32> to vector<2x8x32xf32>
    %23 = vector.shape_cast %21 : vector<2x8xf32> to vector<2x8x1xf32>
    %24 = vector.broadcast %23 : vector<2x8x1xf32> to vector<2x8x32xf32>
    %25 = arith.mulf %22, %24 : vector<2x8x32xf32>
    %cst_19 = arith.constant dense<0.000000e+00> : vector<2x32xf32>
    %26 = vector.multi_reduction <add>, %25, %cst_19 [1] : vector<2x8x32xf32> to vector<2x32xf32>
    %cst_20 = arith.constant dense<0.000000e+00> : vector<2xf32>
    %27 = vector.multi_reduction <add>, %21, %cst_20 [1] : vector<2x8xf32> to vector<2xf32>
    %28 = vector.shape_cast %27 : vector<2xf32> to vector<2x1xf32>
    %cst_21 = arith.constant 1.000000e+00 : f32
    %29 = vector.broadcast %cst_21 : f32 to vector<2x1xf32>
    %30 = arith.maximumf %28, %29 : vector<2x1xf32>
    %31 = vector.broadcast %30 : vector<2x1xf32> to vector<2x32xf32>
    %32 = arith.divf %26, %31 : vector<2x32xf32>
    %c0_22 = arith.constant 0 : index
    %c0_23 = arith.constant 0 : index
    %33 = vector.load %arg13[%c0_22, %c0_23] : memref<2x32xf32, #tpu.memory_space<vmem>>, vector<2x32xf32>
    tpu.vector_store %arg13[%c0_22, %c0_23], %32 {strides = array<i32>} : memref<2x32xf32, #tpu.memory_space<vmem>>, vector<2x32xf32>,
    %34 = arith.truncf %32 : vector<2x32xf32> to vector<2x32xbf16>
    %c0_24 = arith.constant 0 : index
    %c0_25 = arith.constant 0 : index
    %35 = vector.load %arg7[%c0_24, %c0_25] : memref<32x32xbf16, #tpu.memory_space<vmem>>, vector<32x32xbf16>
    %cst_26 = arith.constant dense<0.000000e+00> : vector<2x32xf32>
    %36 = tpu.matmul %34, %35, %cst_26 {dimension_numbers = #tpu.dot_dimension_numbers<[1], [0], [0], [1], [0, 0, 1, 1], [], []>} : vector<2x32xbf16>, vector<32x32xbf16>, vector<2x32xf32> -> vector<2x32xf32>
    %c0_27 = arith.constant 0 : index
    %c0_28 = arith.constant 0 : index
    %37 = vector.load %arg8[%c0_27, %c0_28] : memref<1x32xf32, #tpu.memory_space<vmem>>, vector<1x32xf32>
    %38 = vector.broadcast %37 : vector<1x32xf32> to vector<2x32xf32>
    %39 = arith.addf %36, %38 : vector<2x32xf32>
    %cst_29 = arith.constant 0.000000e+00 : f32
    %40 = vector.broadcast %cst_29 : f32 to vector<2x32xf32>
    %41 = arith.maximumf %39, %40 : vector<2x32xf32>
    %42 = arith.truncf %41 : vector<2x32xf32> to vector<2x32xbf16>
    %c0_30 = arith.constant 0 : index
    %c0_31 = arith.constant 0 : index
    %43 = vector.load %arg9[%c0_30, %c0_31] : memref<32x128xbf16, #tpu.memory_space<vmem>>, vector<32x128xbf16>
    %cst_32 = arith.constant dense<0.000000e+00> : vector<2x128xf32>
    %44 = tpu.matmul %42, %43, %cst_32 {dimension_numbers = #tpu.dot_dimension_numbers<[1], [0], [0], [1], [0, 0, 1, 1], [], []>} : vector<2x32xbf16>, vector<32x128xbf16>, vector<2x128xf32> -> vector<2x128xf32>
    %c0_33 = arith.constant 0 : index
    %c0_34 = arith.constant 0 : index
    %45 = vector.load %arg10[%c0_33, %c0_34] : memref<1x128xf32, #tpu.memory_space<vmem>>, vector<1x128xf32>
    %46 = vector.broadcast %45 : vector<1x128xf32> to vector<2x128xf32>
    %47 = arith.addf %44, %46 : vector<2x128xf32>
    %c0_35 = arith.constant 0 : index
    %c0_36 = arith.constant 0 : index
    %48 = vector.load %arg14[%c0_35, %c0_36] : memref<2x128xf32, #tpu.memory_space<vmem>>, vector<2x128xf32>
    tpu.vector_store %arg14[%c0_35, %c0_36], %47 {strides = array<i32>} : memref<2x128xf32, #tpu.memory_space<vmem>>, vector<2x128xf32>,
    return
  }
  func.func @transform_0(%arg0: i32) -> (i32, i32, i32) {
    %c0_i32 = arith.constant 0 : i32
    %c0_i32_0 = arith.constant 0 : i32
    %c0_i32_1 = arith.constant 0 : i32
    return %arg0, %c0_i32, %c0_i32_0 : i32, i32, i32
  }
  func.func @transform_1(%arg0: i32) -> (i32, i32) {
    %c0_i32 = arith.constant 0 : i32
    %c0_i32_0 = arith.constant 0 : i32
    return %arg0, %c0_i32 : i32, i32
  }
  func.func @transform_2(%arg0: i32) -> (i32, i32) {
    %c0_i32 = arith.constant 0 : i32
    %c0_i32_0 = arith.constant 0 : i32
    %c0_i32_1 = arith.constant 0 : i32
    return %c0_i32, %c0_i32_0 : i32, i32
  }
  func.func @transform_3(%arg0: i32) -> (i32, i32) {
    %c0_i32 = arith.constant 0 : i32
    %c0_i32_0 = arith.constant 0 : i32
    %c0_i32_1 = arith.constant 0 : i32
    return %c0_i32, %c0_i32_0 : i32, i32
  }
  func.func @transform_4(%arg0: i32) -> (i32, i32) {
    %c0_i32 = arith.constant 0 : i32
    %c0_i32_0 = arith.constant 0 : i32
    %c0_i32_1 = arith.constant 0 : i32
    return %c0_i32, %c0_i32_0 : i32, i32
  }
  func.func @transform_5(%arg0: i32) -> (i32, i32) {
    %c0_i32 = arith.constant 0 : i32
    %c0_i32_0 = arith.constant 0 : i32
    %c0_i32_1 = arith.constant 0 : i32
    return %c0_i32, %c0_i32_0 : i32, i32
  }
  func.func @transform_6(%arg0: i32) -> (i32, i32) {
    %c0_i32 = arith.constant 0 : i32
    %c0_i32_0 = arith.constant 0 : i32
    %c0_i32_1 = arith.constant 0 : i32
    return %c0_i32, %c0_i32_0 : i32, i32
  }
  func.func @transform_7(%arg0: i32) -> (i32, i32) {
    %c0_i32 = arith.constant 0 : i32
    %c0_i32_0 = arith.constant 0 : i32
    %c0_i32_1 = arith.constant 0 : i32
    return %c0_i32, %c0_i32_0 : i32, i32
  }
  func.func @transform_8(%arg0: i32) -> (i32, i32) {
    %c0_i32 = arith.constant 0 : i32
    %c0_i32_0 = arith.constant 0 : i32
    %c0_i32_1 = arith.constant 0 : i32
    return %c0_i32, %c0_i32_0 : i32, i32
  }
  func.func @transform_9(%arg0: i32) -> (i32, i32) {
    %c0_i32 = arith.constant 0 : i32
    %c0_i32_0 = arith.constant 0 : i32
    %c0_i32_1 = arith.constant 0 : i32
    return %c0_i32, %c0_i32_0 : i32, i32
  }
  func.func @transform_10(%arg0: i32) -> (i32, i32, i32) {
    %c0_i32 = arith.constant 0 : i32
    %c0_i32_0 = arith.constant 0 : i32
    %c0_i32_1 = arith.constant 0 : i32
    return %arg0, %c0_i32, %c0_i32_0 : i32, i32, i32
  }
  func.func @transform_11(%arg0: i32) -> (i32, i32, i32) {
    %c0_i32 = arith.constant 0 : i32
    %c0_i32_0 = arith.constant 0 : i32
    %c0_i32_1 = arith.constant 0 : i32
    return %arg0, %c0_i32, %c0_i32_0 : i32, i32, i32
  }
  func.func @transform_12(%arg0: i32) -> (i32, i32) {
    %c0_i32 = arith.constant 0 : i32
    %c0_i32_0 = arith.constant 0 : i32
    return %arg0, %c0_i32 : i32, i32
  }
  func.func @transform_13(%arg0: i32) -> (i32, i32) {
    %c0_i32 = arith.constant 0 : i32
    %c0_i32_0 = arith.constant 0 : i32
    return %arg0, %c0_i32 : i32, i32
  }
}

</mosaic_0001>

<bundles_post_ra>
// kernel: tpu_custom_call.1
= control target key start
LH: loop header
LB: loop body
LE: loop exit
PB: predicated region body
PF: predicated region fallthrough
CT: control target
= control target key end

     0   :  { %19 = vsyncpa [#allocation3], 0  ;;  %s1009_s0 = inlined_call_operand.hbm [shape: bf16[2,8,32], index: 0, kind: input, shape index: {}]   ;;  %s1010_s1 = inlined_call_operand.hbm [shape: f32[2,8], index: 1, kind: input, shape index: {}]   ;;  %s1011_s2 = inlined_call_operand.hbm [shape: bf16[32,32], index: 2, kind: input, shape index: {}]   ;;  %s1012_s3 = inlined_call_operand.vmem [shape: f32[1,32], index: 3, kind: input, shape index: {}]   ;;  %s1013_s4 = inlined_call_operand.hbm [shape: bf16[32,32], index: 4, kind: input, shape index: {}]   ;;  %s1014_s5 = inlined_call_operand.vmem [shape: f32[1,32], index: 5, kind: input, shape index: {}]   ;;  %s1015_s6 = inlined_call_operand.hbm [shape: bf16[32,32], index: 6, kind: input, shape index: {}]   ;;  %s1016_s7 = inlined_call_operand.vmem [shape: f32[1,32], index: 7, kind: input, shape index: {}]   ;;  %s1017_s8 = inlined_call_operand.hbm [shape: bf16[32,128], index: 8, kind: input, shape index: {}]   ;;  %s1018_s9 = inlined_call_operand.vmem [shape: f32[1,128], index: 9, kind: input, shape index: {}]   ;;  %s1019_s10 = inlined_call_operand.hbm [shape: bf16[2,8,32], index: 10, kind: output, shape index: {0}]   ;;  %s1020_s11 = inlined_call_operand.hbm [shape: bf16[2,8,32], index: 11, kind: output, shape index: {1}]   ;;  %s1021_s12 = inlined_call_operand.hbm [shape: f32[2,32], index: 12, kind: output, shape index: {2}]   ;;  %s1022_s13 = inlined_call_operand.hbm [shape: f32[2,128], index: 13, kind: output, shape index: {3}]  }
   0x1   :  { %20 = vsyncpa [#allocation6], 0 }
   0x2   :  { %21 = vsyncpa [#allocation9], 0 }
   0x3   :  { %22 = vsyncpa [#allocation12], 0 }
   0x4   :  { %23 = vsyncpa [#allocation4], 0 }
   0x5   :  { %24 = vsyncpa [#allocation15], 0 }
   0x6   :  { %25 = vsyncpa [#allocation18], 0  ;;  %s848_s25 = smov [#allocation5]  }
   0x7   :  { %s44_s26 = sshll.u32 %s848_s25, 4  ;;  %s45_s26 = int_to_ptr.vmem [resolvable:$true] %s44_s26 }
   0x8   :  { %s642_s27 = scalar_lea.vmem %s45_s26, 32  ;;  %p647_p1 = scmp.lt.s32.totalorder %s45_s26, %s45_s26 }
   0x9   :  { %p643_p0 = scmp.ne.s32.totalorder %s45_s26, %s642_s27  ;;  %p648_p2 = scmp.lt.s32.totalorder %s642_s27, %s642_s27 }
   0xb   :  { %p649_p3 = por %p648_p2, %p647_p1 }
   0xd   :  { %p650_p4 = pnand %p649_p3, %p643_p0 }
   0xf   :  { %653 = shalt.err (!%p650_p4)
}
  0x10   :  { %47 = dma.hbm_to_vmem [thread:$0]  %s1010_s1, 32, %s45_s26, [#allocation6]  }
  0x11   :  { %s849_s30 = smov [#allocation8]   ;;  %s850_s15 = smov [#allocation2]  }
  0x12   :  { %s67_s14 = sshll.u32 %s849_s30, 4  ;;  %s31_s16 = sshll.u32 %s850_s15, 4  ;;  %s68_s14 = int_to_ptr.vmem [resolvable:$true] %s67_s14  ;;  %s32_s16 = int_to_ptr.vmem [resolvable:$true] %s31_s16 }
  0x13   :  { %s662_s17 = scalar_lea.vmem %s68_s14, 256  ;;  %p667_p6 = scmp.lt.s32.totalorder %s68_s14, %s68_s14 }
  0x14   :  { %p663_p5 = scmp.ne.s32.totalorder %s68_s14, %s662_s17  ;;  %p668_p7 = scmp.lt.s32.totalorder %s662_s17, %s662_s17 }
  0x16   :  { %p669_p8 = por %p668_p7, %p667_p6 }
  0x18   :  { %p670_p9 = pnand %p669_p8, %p663_p5 }
  0x1a   :  { %673 = shalt.err (!%p670_p9)
}
  0x1b   :  { %s851_s18 = smov 64   ;;  %s852_s19 = smov 4  }
  0x1c   :  { %73 = dma.hbm_to_vmem [thread:$0]  %s1013_s4, 256, %s68_s14, [#allocation9], %s851_s18, %s851_s18, %s852_s19  }
  0x1d   :  { %s682_s1 = scalar_lea.vmem %s32_s16, 128  ;;  %p687_p11 = scmp.lt.s32.totalorder %s32_s16, %s32_s16 }
  0x1e   :  { %p683_p10 = scmp.ne.s32.totalorder %s32_s16, %s682_s1  ;;  %p688_p12 = scmp.lt.s32.totalorder %s682_s1, %s682_s1 }
  0x20   :  { %p689_p13 = por %p688_p12, %p687_p11 }
  0x22   :  { %p690_p0 = pnand %p689_p13, %p683_p10 }
  0x24   :  { %693 = shalt.err (!%p690_p0)
}
  0x25   :  { %37 = dma.hbm_to_vmem [thread:$0]  %s1009_s0, 128, %s32_s16, [#allocation3], %s851_s18, %s851_s18, %s852_s19  }
  0x26   :  { %s853_s24 = smov [#allocation7]   ;;  %s854_s26 = smov [#allocation10]  }
  0x27   :  { %s53_s25 = sshll.u32 %s853_s24, 4  ;;  %s81_s4 = sshll.u32 %s854_s26, 4  ;;  %s54_s25 = int_to_ptr.vmem [resolvable:$true] %s53_s25  ;;  %s82_s4 = int_to_ptr.vmem [resolvable:$true] %s81_s4 }
  0x28   :  { %s702_s27 = scalar_lea.vmem %s54_s25, 256  ;;  %p707_p2 = scmp.lt.s32.totalorder %s54_s25, %s54_s25 }
  0x29   :  { %p703_p1 = scmp.ne.s32.totalorder %s54_s25, %s702_s27  ;;  %p708_p3 = scmp.lt.s32.totalorder %s702_s27, %s702_s27 }
  0x2b   :  { %p709_p4 = por %p708_p3, %p707_p2 }
  0x2d   :  { %p710_p5 = pnand %p709_p4, %p703_p1 }
  0x2f   :  { %713 = shalt.err (!%p710_p5)
}
  0x30   :  { %59 = dma.hbm_to_vmem [thread:$0]  %s1011_s2, 256, %s54_s25, [#allocation6], %s851_s18, %s851_s18, %s852_s19  }
  0x31   :  { %s722_s0 = scalar_lea.vmem %s82_s4, 256  ;;  %p727_p7 = scmp.lt.s32.totalorder %s82_s4, %s82_s4 }
  0x32   :  { %p723_p6 = scmp.ne.s32.totalorder %s82_s4, %s722_s0  ;;  %p728_p8 = scmp.lt.s32.totalorder %s722_s0, %s722_s0 }
  0x34   :  { %p729_p9 = por %p728_p8, %p727_p7 }
  0x36   :  { %p730_p10 = pnand %p729_p9, %p723_p6 }
  0x38   :  { %733 = shalt.err (!%p730_p10)
}
  0x39   :  { %87 = dma.hbm_to_vmem [thread:$0]  %s1015_s6, 256, %s82_s4, [#allocation9], %s851_s18, %s851_s18, %s852_s19  }
  0x3a   :  { %s855_s15 = smov [#allocation11]  }
  0x3b   :  { %s95_s16 = sshll.u32 %s855_s15, 4  ;;  %s96_s16 = int_to_ptr.vmem [resolvable:$true] %s95_s16 }
  0x3c   :  { %s742_s17 = scalar_lea.vmem %s96_s16, 256  ;;  %p747_p12 = scmp.lt.s32.totalorder %s96_s16, %s96_s16 }
  0x3d   :  { %p743_p11 = scmp.ne.s32.totalorder %s96_s16, %s742_s17  ;;  %p748_p13 = scmp.lt.s32.totalorder %s742_s17, %s742_s17 }
  0x3f   :  { %p749_p0 = por %p748_p13, %p747_p12 }
  0x41   :  { %p750_p1 = pnand %p749_p0, %p743_p11 }
  0x43   :  { %753 = shalt.err (!%p750_p1)
}
  0x44   :  { %101 = dma.hbm_to_vmem [thread:$0]  %s1017_s8, 256, %s96_s16, [#allocation12], %s851_s18, %s851_s18, %s852_s19  }
  0x45   :  { %834 = dma.done.wait [#allocation3], 128  }
  0x46   :  { %835 = vsyncadd [#allocation3], 4294967168 }
  0x47   :  { %836 = dma.done.wait [#allocation6], 288  }
  0x48   :  { %837 = vsyncadd [#allocation6], 4294967008 }
  0x49   :  { %838 = dma.done.wait [#allocation9], 512  }
  0x4a   :  { %839 = vsyncadd [#allocation9], 4294966784 }
  0x4b   :  { %840 = dma.done.wait [#allocation12], 256  }
  0x4c   :  { %841 = vsyncadd [#allocation12], 4294967040  ;;  %v856_v0 = vmov 0.0   ;;  %vm857_vm0 = vmmov 0   ;;  %v613_v1 = vld [vmem:[#allocation7 + $0x8] sm:$0xff]   ;;  %v614_v2 = vld [vmem:[#allocation7] sm:$0xff]   ;;  %v280_v7 = vlaneseq }
  0x4d   :  { %567 = vmatprep.subr.bf16.mxu0 %v856_v0  ;;  %571 = vmatprep.mubr.msk.bf16.mxu0 %vm857_vm0, %v856_v0  ;;  %v615_v3 = vld [vmem:[#allocation2] sm:$0xff]   ;;  %vm153_vm1 = vcmask 261120   ;;  %v279_v6 = vld [vmem:[#allocation5] sm:$0x3]  ;;  %vm310_vm2 = vcmask 58368   ;;  %vm202_vm3 = vcmask 257024  }
  0x4e   :  { %575 = vmatprep.subr.bf16.mxu1 %v856_v0  ;;  %579 = vmatprep.mubr.msk.bf16.mxu1 %vm857_vm0, %v856_v0  ;;  %v616_v4 = vld [vmem:[#allocation8 + $0x8] sm:$0xff]   ;;  %v617_v5 = vld [vmem:[#allocation8] sm:$0xff]   ;;  %v311_v8 = vsel %vm310_vm2, %v279_v6, 0.0  ;;  %v281_v9 = vshrl.u32 %v280_v7, 7  ;;  %v618_v26 = vld [vmem:[#allocation10 + $0x8] sm:$0xff]   ;;  %vm326_vm4 = vcmask 1041409  }
  0x4f   :  { %568 = vmatpush3.bf16.msra.mxu0 %v613_v1  ;;  %576 = vmatpush3.bf16.msra.mxu1 %v616_v4  ;;  %v538_v14 = vld [vmem:[%s1012_s3] ss:$0 sm:$0xff]  ;;  %v619_v27 = vld [vmem:[#allocation10] sm:$0xff]   ;;  %v620_v28 = vld [vmem:[#allocation11 + $0x8] sm:$0xff]   ;;  %vm329_vm5 = vcmask 254976   ;;  %s858_s22 = smov [#allocation14]  }
  0x50   :  { %569 = vmatprep.subr.bf16.mxu0 %v856_v0  ;;  %577 = vmatprep.subr.bf16.mxu1 %v856_v0  ;;  %v282_v10 = vsub.s32 0, %v281_v9  ;;  %v289_v12 = vsub.s32 1, %v281_v9  ;;  %v543_v29 = vld [vmem:[%s1014_s5] ss:$0 sm:$0xff]  ;;  %s492_s23 = sshll.u32 %s858_s22, 4  ;;  %s859_s24 = smov [#allocation13]   ;;  %s493_s23 = int_to_ptr.vmem [resolvable:$true] %s492_s23 }
  0x51   :  { %312 = vadd.xlane.f32.xlu0 %v311_v8  ;;  %s480_s25 = sshll.u32 %s859_s24, 4  ;;  %s754_s26 = scalar_lea.vmem %s493_s23, 128  ;;  %s481_s25 = int_to_ptr.vmem [resolvable:$true] %s480_s25 }
  0x52   :  { %v283_v11 = vrot.slane %v279_v6, %v282_v10  ;;  %v290_v13 = vrot.slane %v279_v6, %v289_v12  ;;  %v621_v10 = vld [vmem:[#allocation11] sm:$0xff]   ;;  %p755_p2 = scmp.ne.s32.totalorder %s493_s23, %s754_s26  ;;  %p759_p3 = scmp.lt.s32.totalorder %s493_s23, %s493_s23 }
  0x53   :  { %570 = vmatpush3.bf16.msra.mxu0 %v614_v2  ;;  %578 = vmatpush3.bf16.msra.mxu1 %v617_v5  ;;  %p760_p4 = scmp.lt.s32.totalorder %s754_s26, %s754_s26 }
  0x54   :  { %583 = vmatprep.subr.bf16.mxu0 %v856_v0  ;;  %591 = vmatprep.subr.bf16.mxu1 %v856_v0 }
  0x55   :  { %285 = vbcast.lane.b32.xlu1 %v283_v11, 256  ;;  %v547_v11 = vld [vmem:[%s1016_s7] ss:$0 sm:$0xff]  ;;  %p761_p5 = por %p760_p4, %p759_p3 }
  0x56   :  { %572 = vmatmul.mubr.msk.bf16.vlgmr.msra.gmra.mxu0 %vm153_vm1, %v615_v3 }
  0x57   :  { %587 = vmatprep.mubr.msk.bf16.mxu0 %vm857_vm0, %v856_v0  ;;  %584 = vmatpush3.bf16.msra.mxu0 %v618_v26  ;;  %p762_p6 = pnand %p761_p5, %p755_p2 }
  0x58   :  { %585 = vmatprep.subr.bf16.mxu0 %v856_v0 }
  0x5b   :  { %586 = vmatpush3.bf16.msra.mxu0 %v619_v27 }
  0x67   :  { %292 = vbcast.lane.b32.xlu0 %v290_v13, 256 }
  0xc7   :  { %v286_v38 = vpop.permute.xlu1 %285 }
  0xda   :  { %v313_v36 = vpop.xlane.xlu0 %312 }
  0xdb   :  { %v314_v37 = vmax.f32 %v313_v36, 1.0 }
  0xdd   :  { %v316_v40 = vrot.slane %v314_v37, 1 }
  0xde   :  { %v293_v43 = vpop.permute.xlu0 %292 }
 0x116   :  { %v191_v15 = vpop.f32.mrf.mxu0 }
 0x117   :  { %v192_v16 = vadd.f32 %v538_v14, %v191_v15 }
 0x118   :  { %v573_v17 = vpop.f32.mrf.mxu0 }
 0x119   :  { %622 = vtanh.f32 %v192_v16 }
 0x11a   :  { %v194_v18 = vpop.f32.mrf.mxu0 }
 0x11b   :  { %v195_v19 = vadd.f32 %v538_v14, %v194_v18 }
 0x11c   :  { %v574_v20 = vpop.f32.mrf.mxu0 }
 0x11d   :  { %624 = vtanh.f32 %v195_v19 }
 0x126   :  { %v623_v21 = vpop.eup %622 }
 0x127   :  { %v200_v22 = vpack.c.bf16 %v623_v21, %v623_v21 }
 0x129   :  { %203 = vst.msk [vmem:[#allocation13] sm:$0xf] %vm202_vm3, %v200_v22 }
 0x12a   :  { %v625_v23 = vpop.eup %624 }
 0x12b   :  { %v205_v24 = vpack.c.bf16 %v625_v23, %v623_v21  ;;  %v201_v25 = vpack.c.bf16 %v625_v23, %v625_v23 }
 0x12d   :  { %580 = vmatmul.mubr.msk.bf16.vlgmr.msra.gmra.mxu1 %vm153_vm1, %v205_v24  ;;  %204 = vst.msk [vmem:[#allocation13 + $0x4] sm:$0xf] %vm202_vm3, %v201_v25 }
 0x12e   :  { %595 = vmatprep.mubr.msk.bf16.mxu1 %vm857_vm0, %v856_v0  ;;  %592 = vmatpush3.bf16.msra.mxu1 %v620_v28 }
 0x12f   :  { %593 = vmatprep.subr.bf16.mxu1 %v856_v0 }
 0x132   :  { %594 = vmatpush3.bf16.msra.mxu1 %v621_v10 }
 0x1ed   :  { %v266_v30 = vpop.f32.mrf.mxu1 }
 0x1ee   :  { %v267_v31 = vadd.f32 %v543_v29, %v266_v30 }
 0x1ef   :  { %v581_v32 = vpop.f32.mrf.mxu1 }
 0x1f0   :  { %626 = vtanh.f32 %v267_v31 }
 0x1f1   :  { %v269_v33 = vpop.f32.mrf.mxu1 }
 0x1f2   :  { %v270_v34 = vadd.f32 %v543_v29, %v269_v33 }
 0x1f3   :  { %v582_v35 = vpop.f32.mrf.mxu1 }
 0x1f4   :  { %628 = vtanh.f32 %v270_v34 }
 0x1f5   :  { %630 = vrcp.f32 %v314_v37 }
 0x1f6   :  { %632 = vrcp.f32 %v316_v40 }
 0x1fd   :  { %v627_v39 = vpop.eup %626 }
 0x1fe   :  { %v294_v41 = vmul.f32 %v627_v39, %v286_v38  ;;  %v275_v42 = vpack.c.bf16 %v627_v39, %v627_v39 }
 0x200   :  { %v296_v44 = vsel %vm153_vm1, %v294_v41, 0.0  ;;  %277 = vst.msk [vmem:[#allocation14] sm:$0xf] %vm202_vm3, %v275_v42 }
 0x201   :  { %v629_v45 = vpop.eup %628  ;;  %v297_v46 = vrot.slane %v296_v44, 4 }
 0x202   :  { %v295_v47 = vmul.f32 %v629_v45, %v293_v43  ;;  %v276_v48 = vpack.c.bf16 %v629_v45, %v629_v45  ;;  %v631_v59 = vpop.eup %630 }
 0x203   :  { %v298_v49 = vadd.f32 %v297_v46, %v296_v44  ;;  %v633_v61 = vpop.eup %632 }
 0x204   :  { %v303_v50 = vsel %vm153_vm1, %v295_v47, 0.0  ;;  %278 = vst.msk [vmem:[#allocation14 + $0x4] sm:$0xf] %vm202_vm3, %v276_v48 }
 0x205   :  { %v299_v51 = vrot.slane %v298_v49, 2  ;;  %v304_v52 = vrot.slane %v303_v50, 4 }
 0x207   :  { %v300_v53 = vadd.f32 %v299_v51, %v298_v49  ;;  %v305_v54 = vadd.f32 %v304_v52, %v303_v50 }
 0x209   :  { %v301_v55 = vrot.slane %v300_v53, 1  ;;  %v306_v56 = vrot.slane %v305_v54, 2 }
 0x20b   :  { %v302_v57 = vadd.f32 %v301_v55, %v300_v53  ;;  %v307_v58 = vadd.f32 %v306_v56, %v305_v54 }
 0x20d   :  { %v308_v60 = vrot.slane %v307_v58, 1  ;;  %v320_v62 = vmul.f32 %v631_v59, %v302_v57 }
 0x20f   :  { %v309_v63 = vadd.f32 %v308_v60, %v307_v58  ;;  %v331_v1 = vpack.c.bf16 %v320_v62, %v320_v62 }
 0x211   :  { %v322_v0 = vmul.f32 %v633_v61, %v309_v63  ;;  %v346_v6 = vunpack.c.l.b16 %v331_v1 }
 0x213   :  { %v332_v2 = vpack.c.bf16 %v322_v0, %v322_v0  ;;  %v325_v3 = vrot.slane %v322_v0, 7 }
 0x215   :  { %v347_v4 = vunpack.c.l.b16 %v332_v2  ;;  %v327_v5 = vsel %vm326_vm4, %v325_v3, %v320_v62 }
 0x216   :  { %330 = vst.msk [vmem:[#allocation16] sm:$0x3] %vm329_vm5, %v327_v5 }
 0x217   :  { %v348_v7 = vrot.slane %v347_v4, 7 }
 0x219   :  { %v349_v8 = vsel %vm326_vm4, %v348_v7, %v346_v6 }
 0x21a   :  { %v350_v9 = vpack.c.b16 %v349_v8, %v349_v8 }
 0x21c   :  { %588 = vmatmul.mubr.msk.bf16.vlgmr.msra.gmra.mxu0 %vm153_vm1, %v350_v9 }
 0x2dc   :  { %v400_v12 = vpop.f32.mrf.mxu0 }
 0x2dd   :  { %v401_v13 = vadd.f32 %v547_v11, %v400_v12 }
 0x2de   :  { %v589_v14 = vpop.f32.mrf.mxu0 }
 0x2df   :  { %v406_v15 = vmax.f32 %v401_v13, 0.0 }
 0x2e0   :  { %v403_v16 = vpop.f32.mrf.mxu0 }
 0x2e1   :  { %v407_v17 = vpack.c.bf16 %v406_v15, %v406_v15 }
 0x2e2   :  { %v590_v18 = vpop.f32.mrf.mxu0 }
 0x2e3   :  { %596 = vmatmul.mubr.msk.bf16.vlgmr.msra.gmra.mxu1 %vm153_vm1, %v407_v17 }
 0x2e4   :  { %765 = shalt.err (!%p762_p6)
}
 0x2e5   :  { %498 = dma.vmem_to_hbm [thread:$0]  %s493_s23, 128, %s1020_s11, [#allocation15], %s851_s18, %s851_s18, %s852_s19  }
 0x2e6   :  { %s774_s27 = scalar_lea.vmem %s481_s25, 128  ;;  %p779_p8 = scmp.lt.s32.totalorder %s481_s25, %s481_s25 }
 0x2e7   :  { %p775_p7 = scmp.ne.s32.totalorder %s481_s25, %s774_s27  ;;  %p780_p9 = scmp.lt.s32.totalorder %s774_s27, %s774_s27 }
 0x2e9   :  { %p781_p10 = por %p780_p9, %p779_p8 }
 0x2eb   :  { %p782_p11 = pnand %p781_p10, %p775_p7 }
 0x2ed   :  { %785 = shalt.err (!%p782_p11)
}
 0x2ee   :  { %486 = dma.vmem_to_hbm [thread:$0]  %s481_s25, 128, %s1019_s10, [#allocation4], %s851_s18, %s851_s18, %s852_s19  }
 0x2ef   :  { %s860_s0 = smov [#allocation16]  }
 0x2f0   :  { %s505_s30 = sshll.u32 %s860_s0, 4  ;;  %s506_s30 = int_to_ptr.vmem [resolvable:$true] %s505_s30 }
 0x2f1   :  { %s794_s14 = scalar_lea.vmem %s506_s30, 32  ;;  %p799_p13 = scmp.lt.s32.totalorder %s506_s30, %s506_s30 }
 0x2f2   :  { %p795_p12 = scmp.ne.s32.totalorder %s506_s30, %s794_s14  ;;  %p800_p0 = scmp.lt.s32.totalorder %s794_s14, %s794_s14 }
 0x2f4   :  { %p801_p1 = por %p800_p0, %p799_p13 }
 0x2f6   :  { %p802_p2 = pnand %p801_p1, %p795_p12 }
 0x2f8   :  { %805 = shalt.err (!%p802_p2)
}
 0x2f9   :  { %508 = dma.vmem_to_hbm [thread:$0]  %s506_s30, 32, %s1021_s12, [#allocation15]   ;;  %v551_v19 = vld [vmem:[%s1018_s9] ss:$0 sm:$0xff] }
 0x2fa   :  { %s861_s2 = smov [#allocation17]  }
 0x2fb   :  { %s515_s10 = sshll.u32 %s861_s2, 4  ;;  %s516_s10 = int_to_ptr.vmem [resolvable:$true] %s515_s10 }
 0x2fc   :  { %s814_s18 = scalar_lea.vmem %s516_s10, 32  ;;  %p819_p4 = scmp.lt.s32.totalorder %s516_s10, %s516_s10 }
 0x2fd   :  { %p815_p3 = scmp.ne.s32.totalorder %s516_s10, %s814_s18  ;;  %p820_p5 = scmp.lt.s32.totalorder %s814_s18, %s814_s18 }
 0x2ff   :  { %p821_p6 = por %p820_p5, %p819_p4 }
 0x301   :  { %p822_p7 = pnand %p821_p6, %p815_p3 }
 0x3a3   :  { %v468_v20 = vpop.f32.mrf.mxu1 }
 0x3a4   :  { %v469_v21 = vadd.f32 %v551_v19, %v468_v20 }
 0x3a5   :  { %v597_v22 = vpop.f32.mrf.mxu1 }
 0x3a6   :  { %474 = vst [vmem:[#allocation17] sm:$0x3] %v469_v21 }
 0x3a7   :  { %v471_v23 = vpop.f32.mrf.mxu1 }
 0x3a8   :  { %825 = shalt.err (!%p822_p7)
}
 0x3a9   :  { %518 = dma.vmem_to_hbm [thread:$0]  %s516_s10, 32, %s1022_s13, [#allocation18]   ;;  %v598_v24 = vpop.f32.mrf.mxu1 }
 0x3aa   :  { %842 = dma.done.wait [#allocation4], 128  }
 0x3ab   :  { %843 = vsyncadd [#allocation4], 4294967168 }
 0x3ac   :  { %844 = dma.done.wait [#allocation15], 160  }
 0x3ad   :  { %845 = vsyncadd [#allocation15], 4294967136 }
 0x3ae   :  { %846 = dma.done.wait [#allocation18], 32  }
 0x3af   :  { %847 = vsyncadd [#allocation18], 4294967264 }
 0x3b0   :  { %531 = vsyncpa [#allocation3], 1 }
 0x3b1   :  { %532 = vsyncpa [#allocation6], 1 }
 0x3b2   :  { %533 = vsyncpa [#allocation9], 1 }
 0x3b3   :  { %534 = vsyncpa [#allocation12], 1 }
 0x3b4   :  { %535 = vsyncpa [#allocation4], 1 }
 0x3b5   :  { %536 = vsyncpa [#allocation15], 1 }
 0x3b6   :  { %537 = vsyncpa [#allocation18], 1 }

</bundles_post_ra>
